<compile_context>
chip_gen: v6e
topology: v6e:2x2x1
jax: 0.10.0
libtpu: 0.0.40
codegen_flags: <defaults>
</compile_context>

<pallas_src>
import functools

import numpy as np
import jax
import jax.numpy as jnp
from jax.experimental import pallas as pl
from jax.experimental.pallas import tpu as pltpu


_VMEM_SPEC = pl.BlockSpec(memory_space=pltpu.MemorySpace.VMEM)


# ---------------------------------------------------------------------------
# Kernel 1: batched tiny linears  y[i] = x[i] @ wt[i] + b[i]
#   Single pallas_call, static unroll over the leading axis; at M=2..4 rows the
#   per-call dispatch overhead dwarfs the matmuls, so everything is one call.
# ---------------------------------------------------------------------------
def _batched_linear_kernel(x_ref, wt_ref, b_ref, o_ref, *, batch):
    for i in range(batch):
        o_ref[i] = (jnp.dot(x_ref[i].astype(jnp.bfloat16),
                            wt_ref[i].astype(jnp.bfloat16),
                            preferred_element_type=jnp.float32) + b_ref[i])


def pallas_batched_linear(x, wt, b):
    """x: (T, M, K), wt: (T, K, F), b: (T, 1, F) -> (T, M, F)."""
    x = jnp.asarray(x, jnp.float32)
    wt = jnp.asarray(wt, jnp.float32)
    b = jnp.asarray(b, jnp.float32)
    t, m, _ = x.shape
    f = wt.shape[2]
    return pl.pallas_call(
        functools.partial(_batched_linear_kernel, batch=t),
        out_shape=jax.ShapeDtypeStruct((t, m, f), jnp.float32),
        in_specs=[_VMEM_SPEC, _VMEM_SPEC, _VMEM_SPEC],
        out_specs=_VMEM_SPEC,
    )(x, wt, b)


# ---------------------------------------------------------------------------
# Kernel 2: fused per-metapath GRU + graph attention (edge softmax + sum agg).
#   One grid step == one metapath graph.
# ---------------------------------------------------------------------------
def _fused_metapath_kernel(x_ref, wi_ref, wh_ref, b_ref, attn_ref, mask_ref,
                           mask_t_ref, expand_ref, o_ref, *, seq_len, n_edges,
                           hidden, num_heads, leaky_alpha, out_width):
    # x:      (L*E, D)   sequence-major edge features (timestep t = rows t*E:(t+1)*E)
    # wi:     (D, 3HD)   GRU input weights  (w_ih transposed, gate order [r|z|n])
    # wh:     (HD, 3HD)  GRU hidden weights (w_hh transposed)
    # b:      (2, 3HD)   rows = [b_ih, b_hh]
    # attn:   (HD, H)    block-diagonal per-head attention vector
    # mask:   (N, E)     dst one-hot  (mask[n, e] = 1 iff dst(e) == n)
    # mask_t: (E, N)     its transpose (for per-destination max stabilization)
    # expand: (H, HD)    0/1 matrix broadcasting per-head scalars to head blocks
    # o:      (N, out_width)  aggregated node features, lane-padded to >=128
    e = n_edges
    hd = hidden

    x = x_ref[0].astype(jnp.bfloat16)
    wi = wi_ref[0].astype(jnp.bfloat16)
    wh = wh_ref[0].astype(jnp.bfloat16)
    b = b_ref[0]
    attn_bd = attn_ref[0].astype(jnp.bfloat16)
    mask = mask_ref[0]
    mask_t = mask_t_ref[0]
    expand = expand_ref[...].astype(jnp.bfloat16)
    mask_bf = mask.astype(jnp.bfloat16)
    mask_t_bf = mask_t.astype(jnp.bfloat16)

    # ---- GRU: fused-gate input projection hoisted out of the recurrence.
    gi = jnp.dot(x, wi, preferred_element_type=jnp.float32) + b[0:1]     # (L*E, 3HD)
    h = jnp.zeros((e, hd), jnp.float32)
    # TODO(synk): for long metapaths switch to lax.fori_loop(..., unroll=True)
    # to bound vreg/VMEM live ranges.
    for t in range(seq_len):
        gh = (jnp.dot(h.astype(jnp.bfloat16), wh,
                      preferred_element_type=jnp.float32) + b[1:2])      # (E, 3HD)
        git = gi[t * e:(t + 1) * e]
        r = jax.nn.sigmoid(git[:, 0:hd] + gh[:, 0:hd])
        z = jax.nn.sigmoid(git[:, hd:2 * hd] + gh[:, hd:2 * hd])
        n = jnp.tanh(git[:, 2 * hd:3 * hd] + r * gh[:, 2 * hd:3 * hd])
        h = (1.0 - z) * n + z * h                                        # (E, HD)

    # ---- per-head attention logits (block-diagonal matmul) + LeakyReLU
    a = jnp.dot(h.astype(jnp.bfloat16), attn_bd,
                preferred_element_type=jnp.float32)                      # (E, H)
    a = jnp.where(a >= 0.0, a, leaky_alpha * a)

    # ---- DGL-exact edge softmax: per-destination max stabilization.
    #      dst_max_t[h, n] = max over incoming edges of a[e, h]  (shift trick
    #      keeps masked-out entries below every real logit).
    amin = jnp.min(a, keepdims=True)                                     # (1, 1)
    rows = []
    for hh in range(num_heads):                                          # static, tiny
        col = a[:, hh:hh + 1] - amin                                     # (E, 1) >= 0
        rows.append(jnp.max(mask_t * col, axis=0, keepdims=True))        # (1, N)
    dst_max_t = jnp.concatenate(rows, axis=0) + amin                     # (H, N)
    edge_max = jax.lax.dot_general(                                      # (E, H)
        mask_t_bf, dst_max_t.astype(jnp.bfloat16),
        (((1,), (1,)), ((), ())), preferred_element_type=jnp.float32)
    ex = jnp.exp(a - edge_max)                                           # (E, H), <= ~1

    # ---- softmax-weighted sum aggregation per destination node
    ex_bf = ex.astype(jnp.bfloat16)
    ex_rep = jnp.dot(ex_bf, expand, preferred_element_type=jnp.float32)  # (E, HD)
    weighted = (h * ex_rep).astype(jnp.bfloat16)
    num = jnp.dot(mask_bf, weighted, preferred_element_type=jnp.float32)  # (N, HD)
    den = jnp.dot(mask_bf, ex_bf, preferred_element_type=jnp.float32)     # (N, H)
    inv = pl.reciprocal(jnp.where(den > 0.0, den, 1.0), approx=True)      # (N, H)
    inv_rep = jnp.dot(inv.astype(jnp.bfloat16), expand,
                      preferred_element_type=jnp.float32)                 # (N, HD)
    out = num * inv_rep
    out = jnp.where(out > 0.0, out, jnp.exp(out) - 1.0)                   # fused F.elu
    if out_width > hd:                                                    # lane-dense store
        pad = jnp.zeros((out.shape[0], out_width - hd), jnp.float32)
        out = jnp.concatenate([out, pad], axis=1)
    o_ref[0] = out


def fused_metapath_attention(x_flat, wi, wh, b, attn_bd, mask, mask_t, expand,
                             num_heads, head_dim, leaky_alpha=0.001):
    """Run GRU + graph attention + ELU for P metapaths in one pallas_call."""
    x_flat = jnp.asarray(x_flat, jnp.float32)
    p, le, d = x_flat.shape
    hd = num_heads * head_dim
    n_pad, e_pad = mask.shape[1], mask.shape[2]
    seq_len = le // e_pad
    out_width = max(hd, ((hd + 127) // 128) * 128)

    kernel = functools.partial(
        _fused_metapath_kernel, seq_len=seq_len, n_edges=e_pad, hidden=hd,
        num_heads=num_heads, leaky_alpha=float(leaky_alpha), out_width=out_width)

    # Explicit scoped-VMEM budget (v5e's default is only 16 MiB; v7x has 64 MiB
    # physical) -- generous multiple of one double-buffered block, clamped.
    blk_bytes = 4 * (le * d + d * 3 * hd + hd * 3 * hd + 2 * 3 * hd
                     + hd * num_heads + 2 * n_pad * e_pad + num_heads * hd
                     + n_pad * out_width)
    vmem_limit = int(min(96 * 1024 * 1024, max(8 * 1024 * 1024, 16 * blk_bytes)))

    out = pl.pallas_call(
        kernel,
        out_shape=jax.ShapeDtypeStruct((p, n_pad, out_width), jnp.float32),
        grid_spec=pltpu.PrefetchScalarGridSpec(
            num_scalar_prefetch=0,
            grid=(p,),
            in_specs=[
                pl.BlockSpec((1, le, d), lambda i: (i, 0, 0)),
                pl.BlockSpec((1, d, 3 * hd), lambda i: (i, 0, 0)),
                pl.BlockSpec((1, hd, 3 * hd), lambda i: (i, 0, 0)),
                pl.BlockSpec((1, 2, 3 * hd), lambda i: (i, 0, 0)),
                pl.BlockSpec((1, hd, num_heads), lambda i: (i, 0, 0)),
                pl.BlockSpec((1, n_pad, e_pad), lambda i: (i, 0, 0)),
                pl.BlockSpec((1, e_pad, n_pad), lambda i: (i, 0, 0)),
                pl.BlockSpec((num_heads, hd), lambda i: (0, 0)),
            ],
            out_specs=pl.BlockSpec((1, n_pad, out_width), lambda i: (i, 0, 0)),
        ),
        # TODO(synk): on v7x use pltpu.CORE_PARALLEL here to split P over 2 TCs.
        compiler_params=pltpu.CompilerParams(
            dimension_semantics=("parallel",),
            vmem_limit_bytes=vmem_limit),
    )(x_flat, wi, wh, b, attn_bd, mask, mask_t, expand)
    return out[..., :hd]


# ---------------------------------------------------------------------------
# Forward-pass glue (plain JAX; hot paths in Pallas)
# ---------------------------------------------------------------------------
def _round_up(v, m):
    return ((v + m - 1) // m) * m


def project_input_features(features_list, fc_params, hidden_dim):
    """All five per-type input projections in ONE batched pallas_call."""
    t = len(features_list)
    max_n = max(int(f.shape[0]) for f in features_list)
    max_k = max(int(f.shape[1]) for f in features_list)
    x = np.zeros((t, max_n, max_k), np.float32)
    wt = np.zeros((t, max_k, hidden_dim), np.float32)
    bb = np.zeros((t, 1, hidden_dim), np.float32)
    for i, f in enumerate(features_list):
        fa = np.asarray(f, np.float32)
        x[i, :fa.shape[0], :fa.shape[1]] = fa
        w = np.asarray(fc_params[i]["w"], np.float32)          # (hidden, feats_dim)
        wt[i, :w.shape[1], :] = w.T
        bb[i, 0, :] = np.asarray(fc_params[i]["b"], np.float32)
    y = pallas_batched_linear(jnp.asarray(x), jnp.asarray(wt), jnp.asarray(bb))
    return [y[i, :int(features_list[i].shape[0]), :] for i in range(t)]


def prepare_layer1_inputs(params, g_lists, edge_idx_lists, num_heads, hidden_dim):
    """Stack per-metapath static data (weights, dst one-hots, indices) along P."""
    d = hidden_dim
    h_heads = num_heads
    hd = h_heads * d
    n_types = len(g_lists)

    e_sizes, l_sizes, n_sizes = [], [], []
    for t in range(n_types):
        for m_i in range(len(edge_idx_lists[t])):
            ei = np.asarray(edge_idx_lists[t][m_i])
            e_sizes.append(ei.shape[0])
            l_sizes.append(ei.shape[1])
            n_sizes.append(int(g_lists[t][m_i]["num_nodes"]))
    seq_len = l_sizes[0]
    assert all(l == seq_len for l in l_sizes)  # TODO(synk): ragged metapath lengths
    e_pad = _round_up(max(e_sizes), 8)
    n_pad = _round_up(max(n_sizes), 8)

    eidx_l, mask_l, mask_t_l, wi_l, wh_l, b_l, abd_l = [], [], [], [], [], [], []
    fco_wt, fco_b, slots = [], [], []
    eye = jnp.eye(h_heads, dtype=jnp.float32)
    p = 0
    for t in range(n_types):
        ctr = params["layer1"]["ctr"][t]
        tslots = []
        for m_i in range(len(edge_idx_lists[t])):
            ei = np.asarray(edge_idx_lists[t][m_i])
            e_real = ei.shape[0]
            # time-major edge indices -> the feature gather needs NO transpose
            ei_pad = np.zeros((seq_len, e_pad), np.int32)
            ei_pad[:, :e_real] = ei.T
            eidx_l.append(jnp.asarray(ei_pad))

            dst = np.asarray(g_lists[t][m_i]["dst"])
            mask = np.zeros((n_pad, e_pad), np.float32)
            mask[dst, np.arange(e_real)] = 1.0          # padded edges / nodes stay 0
            mask_l.append(jnp.asarray(mask))
            mask_t_l.append(jnp.asarray(mask.T))

            mp = ctr["metapaths"][m_i]
            wi_l.append(jnp.asarray(mp["w_ih"], jnp.float32).T)   # (D, 3HD)
            wh_l.append(jnp.asarray(mp["w_hh"], jnp.float32).T)   # (HD, 3HD)
            b_l.append(jnp.stack([jnp.asarray(mp["b_ih"], jnp.float32),
                                  jnp.asarray(mp["b_hh"], jnp.float32)], axis=0))
            attn = jnp.asarray(mp["attn"], jnp.float32)           # (H, D)
            abd_l.append((attn[:, :, None] * eye[:, None, :]).reshape(hd, h_heads))
            tslots.append(p)
            p += 1
        slots.append(tslots)
        fco = params["layer1"]["fc_out"][t]
        fco_wt.append(jnp.asarray(fco["w"], jnp.float32).T)
        fco_b.append(jnp.asarray(fco["b"], jnp.float32).reshape(1, -1))

    return {
        "P": p, "L": seq_len, "E_pad": e_pad, "N_pad": n_pad,
        "D": d, "H": h_heads, "HD": hd, "slots": slots,
        "eidx": jnp.stack(eidx_l),         # (P, L, E_pad)   time-major
        "mask": jnp.stack(mask_l),         # (P, N_pad, E_pad)
        "mask_t": jnp.stack(mask_t_l),     # (P, E_pad, N_pad)
        "wi": jnp.stack(wi_l),             # (P, D, 3HD)
        "wh": jnp.stack(wh_l),             # (P, HD, 3HD)
        "b": jnp.stack(b_l),               # (P, 2, 3HD)
        "attn_bd": jnp.stack(abd_l),       # (P, HD, H)
        "expand": jnp.repeat(eye, d, axis=1),   # (H, HD)
        "fco_wt": jnp.stack(fco_wt),       # (T, HD, out_dim)
        "fco_b": jnp.stack(fco_b),         # (T, 1, out_dim)
    }


def layer1_forward(prep, params_layer1, tf, target_idx_lists):
    p_tot, seq_len, e_pad, d = prep["P"], prep["L"], prep["E_pad"], prep["D"]
    # one gather + ONE fused pallas_call for all metapaths of all node types;
    # eidx is time-major so the reshape below is contiguous (no transpose).
    edata = tf[prep["eidx"]]                                       # (P, L, E_pad, D)
    x_flat = edata.reshape(p_tot, seq_len * e_pad, d)
    node_ft = fused_metapath_attention(
        x_flat, prep["wi"], prep["wh"], prep["b"], prep["attn_bd"],
        prep["mask"], prep["mask_t"], prep["expand"], prep["H"], d,
        leaky_alpha=0.001)                 # nn.LeakyReLU(alpha=0.001) module default
    # ELU already fused inside the kernel.

    h_list = []
    n_types = len(prep["slots"])
    for t in range(n_types):
        ctr = params_layer1["ctr"][t]
        fc1_w = jnp.asarray(ctr["fc1_w"], jnp.float32)
        fc1_b = jnp.asarray(ctr["fc1_b"], jnp.float32)
        fc2_w = jnp.asarray(ctr["fc2_w"], jnp.float32)
        mp_outs, betas = [], []
        for j, slot in enumerate(prep["slots"][t]):
            out = node_ft[slot][target_idx_lists[t][j]]            # (B, HD)
            mp_outs.append(out)
            # tiny attention-beta MLP: plain jnp (Pallas dispatch would dominate)
            fc1 = jnp.tanh(out @ fc1_w.T + fc1_b)
            betas.append(jnp.mean(fc1, axis=0) @ fc2_w.T)          # (1,)
        beta = jax.nn.softmax(jnp.concatenate(betas, axis=0), axis=0)
        stacked = jnp.stack(mp_outs, axis=0)                       # (P_t, B, HD)
        h_list.append(jnp.sum(beta[:, None, None] * stacked, axis=0))

    batch_sizes = {int(h.shape[0]) for h in h_list}
    if len(batch_sizes) == 1:
        h_all = jnp.stack(h_list, axis=0)                          # (T, B, HD)
        logits_all = pallas_batched_linear(h_all, prep["fco_wt"], prep["fco_b"])
        logits_list = [logits_all[t] for t in range(n_types)]
    else:
        # TODO(synk): unequal per-type batch sizes -> plain XLA fallback (tiny)
        logits_list = [h_list[t] @ prep["fco_wt"][t] + prep["fco_b"][t]
                       for t in range(n_types)]
    return logits_list, h_list


def pabdmh_lp_forward(params, g_lists, features_list, type_mask, edge_idx_lists,
                      target_idx_lists, data, num, num_embeding,
                      hidden_dim, num_heads):
    n_total = type_mask.shape[0]
    proj = project_input_features(features_list, params["fc_list"], hidden_dim)
    tf = jnp.zeros((n_total, hidden_dim), jnp.float32)
    for i in range(len(features_list)):
        idx = np.where(np.asarray(type_mask) == i)[0].astype(np.int32)
        tf = tf.at[jnp.asarray(idx)].set(proj[i])
    # TODO(synk): feat_drop treated as identity (eval mode)

    prep = prepare_layer1_inputs(params, g_lists, edge_idx_lists,
                                 num_heads, hidden_dim)
    layer1_fn = jax.jit(functools.partial(layer1_forward, prep, params["layer1"]))

    offsets = [0,
               num[0],
               num[0] + num[1],
               num[0] + num[1] + num[2],
               num[0] + num[3] + num[1] + num[2]]     # as written in the reference code
    l_lists = [tf[jnp.asarray(node_type, jnp.int32) + offsets[i]]
               for i, node_type in enumerate(data)]

    # Deduplicated embedding loop: the call at the end of one iteration and the
    # one at the top of the next run on identical features -> compute it once.
    res = layer1_fn(tf, target_idx_lists)
    for _ in range(num_embeding):
        logits_list, _ = res
        new_logits = [jnp.maximum(lg + l_lists[i], 0.0)            # F.relu(logits + stack(l))
                      for i, lg in enumerate(logits_list)]
        for i, node_type in enumerate(data):
            gl = jnp.asarray(node_type, jnp.int32) + offsets[i]
            tf = tf.at[gl].set(new_logits[i])
        res = layer1_fn(tf, target_idx_lists)
    logits_list, h_list = res
    return logits_list, h_list


# ---------------------------------------------------------------------------
# Deterministic parameter init (synthetic -- shapes follow the module __init__)
# ---------------------------------------------------------------------------
def init_params(key, feats_dim_list, hidden_dim, out_dim, num_heads, attn_vec_dim,
                num_metapaths_list):
    keys = iter(jax.random.split(key, 512))

    def nrm(shape, scale=0.1):
        return scale * jax.random.normal(next(keys), shape, jnp.float32)

    hd = num_heads * hidden_dim
    params = {"fc_list": [{"w": nrm((hidden_dim, fd)), "b": nrm((hidden_dim,))}
                          for fd in feats_dim_list]}
    ctr, fc_out = [], []
    for n_mp in num_metapaths_list:
        mps = []
        for _ in range(n_mp):
            mps.append({
                "w_ih": nrm((3 * hd, hidden_dim)),   # nn.GRU(out_dim, num_heads*out_dim)
                "w_hh": nrm((3 * hd, hd)),
                "b_ih": nrm((3 * hd,)),
                "b_hh": nrm((3 * hd,)),
                "attn": nrm((num_heads, hidden_dim)),
            })
        ctr.append({
            "metapaths": mps,
            "fc1_w": nrm((attn_vec_dim, hd)), "fc1_b": nrm((attn_vec_dim,)),
            "fc2_w": nrm((1, attn_vec_dim)),
        })
        fc_out.append({"w": nrm((out_dim, hd)), "b": nrm((out_dim,))})
    params["layer1"] = {"ctr": ctr, "fc_out": fc_out}
    return params


# ---------------------------------------------------------------------------
# Main
# ---------------------------------------------------------------------------
if __name__ == "__main__":
    key = jax.random.PRNGKey(0)
    kiter = iter(jax.random.split(key, 256))

    feats_dim_list = [10, 12, 8, 6, 14]      # raw feature dims per node type
    num = [4, 3, 3, 3, 3]                    # node counts per type
    n_total = sum(num)
    hidden_dim = 16
    out_dim = 16                             # must equal hidden_dim for the write-back
    num_heads = 2
    attn_vec_dim = 8
    num_metapaths_list = [2, 1, 1, 1, 1]
    metapath_len = 3
    num_embeding = 1
    batch_per_type = 2

    features_list = [jax.random.normal(next(kiter), (num[i], feats_dim_list[i]),
                                       jnp.float32) for i in range(5)]
    type_mask = np.concatenate([np.full(num[i], i, dtype=np.int64) for i in range(5)])
    data = [np.arange(batch_per_type) for _ in range(5)]

    g_lists, edge_idx_lists, target_idx_lists = [], [], []
    for t in range(5):
        gs, eis, tis = [], [], []
        for _ in range(num_metapaths_list[t]):
            n_local, n_edges = 6, 8
            dst = jax.random.randint(next(kiter), (n_edges,), 0, n_local)
            ei = jax.random.randint(next(kiter), (n_edges, metapath_len), 0, n_total)
            tix = jax.random.randint(next(kiter), (batch_per_type,), 0, n_local)
            gs.append({"dst": dst, "num_nodes": n_local})
            eis.append(ei)
            tis.append(tix)
        g_lists.append(gs)
        edge_idx_lists.append(eis)
        target_idx_lists.append(tis)

    params = init_params(next(kiter), feats_dim_list, hidden_dim, out_dim,
                         num_heads, attn_vec_dim, num_metapaths_list)

    logits_list, h_list = pabdmh_lp_forward(
        params, g_lists, features_list, type_mask, edge_idx_lists,
        target_idx_lists, data, num, num_embeding, hidden_dim, num_heads)

    for arr in logits_list + h_list:
        jax.block_until_ready(arr)

    print("KERNEL_OK")
</pallas_src>

<mosaic_0001>
module attributes {stable_mosaic.version = 11 : i64} {
  func.func @_batched_linear_kernel(%arg0: memref<5x4x14xf32, #tpu.memory_space<vmem>>, %arg1: memref<5x14x16xf32, #tpu.memory_space<vmem>>, %arg2: memref<5x1x16xf32, #tpu.memory_space<vmem>>, %arg3: memref<5x4x16xf32, #tpu.memory_space<vmem>>) attributes {dimension_semantics = [], scalar_prefetch = 0 : i64, scratch_operands = 0 : i64, tpu.core_type = #tpu.core_type<tc>} {
    %c0 = arith.constant 0 : index
    %c0_0 = arith.constant 0 : index
    %c0_1 = arith.constant 0 : index
    %0 = vector.load %arg0[%c0, %c0_0, %c0_1] : memref<5x4x14xf32, #tpu.memory_space<vmem>>, vector<1x4x14xf32>
    %1 = vector.shape_cast %0 : vector<1x4x14xf32> to vector<4x14xf32>
    %2 = arith.truncf %1 : vector<4x14xf32> to vector<4x14xbf16>
    %c0_2 = arith.constant 0 : index
    %c0_3 = arith.constant 0 : index
    %c0_4 = arith.constant 0 : index
    %3 = vector.load %arg1[%c0_2, %c0_3, %c0_4] : memref<5x14x16xf32, #tpu.memory_space<vmem>>, vector<1x14x16xf32>
    %4 = vector.shape_cast %3 : vector<1x14x16xf32> to vector<14x16xf32>
    %5 = arith.truncf %4 : vector<14x16xf32> to vector<14x16xbf16>
    %cst = arith.constant dense<0.000000e+00> : vector<4x16xf32>
    %6 = tpu.matmul %2, %5, %cst {dimension_numbers = #tpu.dot_dimension_numbers<[1], [0], [0], [1], [0, 0, 1, 1], [], []>} : vector<4x14xbf16>, vector<14x16xbf16>, vector<4x16xf32> -> vector<4x16xf32>
    %c0_5 = arith.constant 0 : index
    %c0_6 = arith.constant 0 : index
    %c0_7 = arith.constant 0 : index
    %7 = vector.load %arg2[%c0_5, %c0_6, %c0_7] : memref<5x1x16xf32, #tpu.memory_space<vmem>>, vector<1x1x16xf32>
    %8 = vector.shape_cast %7 : vector<1x1x16xf32> to vector<1x16xf32>
    %9 = vector.broadcast %8 : vector<1x16xf32> to vector<4x16xf32>
    %10 = arith.addf %6, %9 : vector<4x16xf32>
    %c0_8 = arith.constant 0 : index
    %c0_9 = arith.constant 0 : index
    %c0_10 = arith.constant 0 : index
    %11 = vector.load %arg3[%c0_8, %c0_9, %c0_10] : memref<5x4x16xf32, #tpu.memory_space<vmem>>, vector<1x4x16xf32>
    %12 = vector.shape_cast %11 : vector<1x4x16xf32> to vector<4x16xf32>
    %13 = vector.shape_cast %10 : vector<4x16xf32> to vector<1x4x16xf32>
    tpu.vector_store %arg3[%c0_8, %c0_9, %c0_10], %13 {strides = array<i32>} : memref<5x4x16xf32, #tpu.memory_space<vmem>>, vector<1x4x16xf32>,
    %c1 = arith.constant 1 : index
    %c0_11 = arith.constant 0 : index
    %c0_12 = arith.constant 0 : index
    %14 = vector.load %arg0[%c1, %c0_11, %c0_12] : memref<5x4x14xf32, #tpu.memory_space<vmem>>, vector<1x4x14xf32>
    %15 = vector.shape_cast %14 : vector<1x4x14xf32> to vector<4x14xf32>
    %16 = arith.truncf %15 : vector<4x14xf32> to vector<4x14xbf16>
    %c1_13 = arith.constant 1 : index
    %c0_14 = arith.constant 0 : index
    %c0_15 = arith.constant 0 : index
    %17 = vector.load %arg1[%c1_13, %c0_14, %c0_15] : memref<5x14x16xf32, #tpu.memory_space<vmem>>, vector<1x14x16xf32>
    %18 = vector.shape_cast %17 : vector<1x14x16xf32> to vector<14x16xf32>
    %19 = arith.truncf %18 : vector<14x16xf32> to vector<14x16xbf16>
    %cst_16 = arith.constant dense<0.000000e+00> : vector<4x16xf32>
    %20 = tpu.matmul %16, %19, %cst_16 {dimension_numbers = #tpu.dot_dimension_numbers<[1], [0], [0], [1], [0, 0, 1, 1], [], []>} : vector<4x14xbf16>, vector<14x16xbf16>, vector<4x16xf32> -> vector<4x16xf32>
    %c1_17 = arith.constant 1 : index
    %c0_18 = arith.constant 0 : index
    %c0_19 = arith.constant 0 : index
    %21 = vector.load %arg2[%c1_17, %c0_18, %c0_19] : memref<5x1x16xf32, #tpu.memory_space<vmem>>, vector<1x1x16xf32>
    %22 = vector.shape_cast %21 : vector<1x1x16xf32> to vector<1x16xf32>
    %23 = vector.broadcast %22 : vector<1x16xf32> to vector<4x16xf32>
    %24 = arith.addf %20, %23 : vector<4x16xf32>
    %c1_20 = arith.constant 1 : index
    %c0_21 = arith.constant 0 : index
    %c0_22 = arith.constant 0 : index
    %25 = vector.load %arg3[%c1_20, %c0_21, %c0_22] : memref<5x4x16xf32, #tpu.memory_space<vmem>>, vector<1x4x16xf32>
    %26 = vector.shape_cast %25 : vector<1x4x16xf32> to vector<4x16xf32>
    %27 = vector.shape_cast %24 : vector<4x16xf32> to vector<1x4x16xf32>
    tpu.vector_store %arg3[%c1_20, %c0_21, %c0_22], %27 {strides = array<i32>} : memref<5x4x16xf32, #tpu.memory_space<vmem>>, vector<1x4x16xf32>,
    %c2 = arith.constant 2 : index
    %c0_23 = arith.constant 0 : index
    %c0_24 = arith.constant 0 : index
    %28 = vector.load %arg0[%c2, %c0_23, %c0_24] : memref<5x4x14xf32, #tpu.memory_space<vmem>>, vector<1x4x14xf32>
    %29 = vector.shape_cast %28 : vector<1x4x14xf32> to vector<4x14xf32>
    %30 = arith.truncf %29 : vector<4x14xf32> to vector<4x14xbf16>
    %c2_25 = arith.constant 2 : index
    %c0_26 = arith.constant 0 : index
    %c0_27 = arith.constant 0 : index
    %31 = vector.load %arg1[%c2_25, %c0_26, %c0_27] : memref<5x14x16xf32, #tpu.memory_space<vmem>>, vector<1x14x16xf32>
    %32 = vector.shape_cast %31 : vector<1x14x16xf32> to vector<14x16xf32>
    %33 = arith.truncf %32 : vector<14x16xf32> to vector<14x16xbf16>
    %cst_28 = arith.constant dense<0.000000e+00> : vector<4x16xf32>
    %34 = tpu.matmul %30, %33, %cst_28 {dimension_numbers = #tpu.dot_dimension_numbers<[1], [0], [0], [1], [0, 0, 1, 1], [], []>} : vector<4x14xbf16>, vector<14x16xbf16>, vector<4x16xf32> -> vector<4x16xf32>
    %c2_29 = arith.constant 2 : index
    %c0_30 = arith.constant 0 : index
    %c0_31 = arith.constant 0 : index
    %35 = vector.load %arg2[%c2_29, %c0_30, %c0_31] : memref<5x1x16xf32, #tpu.memory_space<vmem>>, vector<1x1x16xf32>
    %36 = vector.shape_cast %35 : vector<1x1x16xf32> to vector<1x16xf32>
    %37 = vector.broadcast %36 : vector<1x16xf32> to vector<4x16xf32>
    %38 = arith.addf %34, %37 : vector<4x16xf32>
    %c2_32 = arith.constant 2 : index
    %c0_33 = arith.constant 0 : index
    %c0_34 = arith.constant 0 : index
    %39 = vector.load %arg3[%c2_32, %c0_33, %c0_34] : memref<5x4x16xf32, #tpu.memory_space<vmem>>, vector<1x4x16xf32>
    %40 = vector.shape_cast %39 : vector<1x4x16xf32> to vector<4x16xf32>
    %41 = vector.shape_cast %38 : vector<4x16xf32> to vector<1x4x16xf32>
    tpu.vector_store %arg3[%c2_32, %c0_33, %c0_34], %41 {strides = array<i32>} : memref<5x4x16xf32, #tpu.memory_space<vmem>>, vector<1x4x16xf32>,
    %c3 = arith.constant 3 : index
    %c0_35 = arith.constant 0 : index
    %c0_36 = arith.constant 0 : index
    %42 = vector.load %arg0[%c3, %c0_35, %c0_36] : memref<5x4x14xf32, #tpu.memory_space<vmem>>, vector<1x4x14xf32>
    %43 = vector.shape_cast %42 : vector<1x4x14xf32> to vector<4x14xf32>
    %44 = arith.truncf %43 : vector<4x14xf32> to vector<4x14xbf16>
    %c3_37 = arith.constant 3 : index
    %c0_38 = arith.constant 0 : index
    %c0_39 = arith.constant 0 : index
    %45 = vector.load %arg1[%c3_37, %c0_38, %c0_39] : memref<5x14x16xf32, #tpu.memory_space<vmem>>, vector<1x14x16xf32>
    %46 = vector.shape_cast %45 : vector<1x14x16xf32> to vector<14x16xf32>
    %47 = arith.truncf %46 : vector<14x16xf32> to vector<14x16xbf16>
    %cst_40 = arith.constant dense<0.000000e+00> : vector<4x16xf32>
    %48 = tpu.matmul %44, %47, %cst_40 {dimension_numbers = #tpu.dot_dimension_numbers<[1], [0], [0], [1], [0, 0, 1, 1], [], []>} : vector<4x14xbf16>, vector<14x16xbf16>, vector<4x16xf32> -> vector<4x16xf32>
    %c3_41 = arith.constant 3 : index
    %c0_42 = arith.constant 0 : index
    %c0_43 = arith.constant 0 : index
    %49 = vector.load %arg2[%c3_41, %c0_42, %c0_43] : memref<5x1x16xf32, #tpu.memory_space<vmem>>, vector<1x1x16xf32>
    %50 = vector.shape_cast %49 : vector<1x1x16xf32> to vector<1x16xf32>
    %51 = vector.broadcast %50 : vector<1x16xf32> to vector<4x16xf32>
    %52 = arith.addf %48, %51 : vector<4x16xf32>
    %c3_44 = arith.constant 3 : index
    %c0_45 = arith.constant 0 : index
    %c0_46 = arith.constant 0 : index
    %53 = vector.load %arg3[%c3_44, %c0_45, %c0_46] : memref<5x4x16xf32, #tpu.memory_space<vmem>>, vector<1x4x16xf32>
    %54 = vector.shape_cast %53 : vector<1x4x16xf32> to vector<4x16xf32>
    %55 = vector.shape_cast %52 : vector<4x16xf32> to vector<1x4x16xf32>
    tpu.vector_store %arg3[%c3_44, %c0_45, %c0_46], %55 {strides = array<i32>} : memref<5x4x16xf32, #tpu.memory_space<vmem>>, vector<1x4x16xf32>,
    %c4 = arith.constant 4 : index
    %c0_47 = arith.constant 0 : index
    %c0_48 = arith.constant 0 : index
    %56 = vector.load %arg0[%c4, %c0_47, %c0_48] : memref<5x4x14xf32, #tpu.memory_space<vmem>>, vector<1x4x14xf32>
    %57 = vector.shape_cast %56 : vector<1x4x14xf32> to vector<4x14xf32>
    %58 = arith.truncf %57 : vector<4x14xf32> to vector<4x14xbf16>
    %c4_49 = arith.constant 4 : index
    %c0_50 = arith.constant 0 : index
    %c0_51 = arith.constant 0 : index
    %59 = vector.load %arg1[%c4_49, %c0_50, %c0_51] : memref<5x14x16xf32, #tpu.memory_space<vmem>>, vector<1x14x16xf32>
    %60 = vector.shape_cast %59 : vector<1x14x16xf32> to vector<14x16xf32>
    %61 = arith.truncf %60 : vector<14x16xf32> to vector<14x16xbf16>
    %cst_52 = arith.constant dense<0.000000e+00> : vector<4x16xf32>
    %62 = tpu.matmul %58, %61, %cst_52 {dimension_numbers = #tpu.dot_dimension_numbers<[1], [0], [0], [1], [0, 0, 1, 1], [], []>} : vector<4x14xbf16>, vector<14x16xbf16>, vector<4x16xf32> -> vector<4x16xf32>
    %c4_53 = arith.constant 4 : index
    %c0_54 = arith.constant 0 : index
    %c0_55 = arith.constant 0 : index
    %63 = vector.load %arg2[%c4_53, %c0_54, %c0_55] : memref<5x1x16xf32, #tpu.memory_space<vmem>>, vector<1x1x16xf32>
    %64 = vector.shape_cast %63 : vector<1x1x16xf32> to vector<1x16xf32>
    %65 = vector.broadcast %64 : vector<1x16xf32> to vector<4x16xf32>
    %66 = arith.addf %62, %65 : vector<4x16xf32>
    %c4_56 = arith.constant 4 : index
    %c0_57 = arith.constant 0 : index
    %c0_58 = arith.constant 0 : index
    %67 = vector.load %arg3[%c4_56, %c0_57, %c0_58] : memref<5x4x16xf32, #tpu.memory_space<vmem>>, vector<1x4x16xf32>
    %68 = vector.shape_cast %67 : vector<1x4x16xf32> to vector<4x16xf32>
    %69 = vector.shape_cast %66 : vector<4x16xf32> to vector<1x4x16xf32>
    tpu.vector_store %arg3[%c4_56, %c0_57, %c0_58], %69 {strides = array<i32>} : memref<5x4x16xf32, #tpu.memory_space<vmem>>, vector<1x4x16xf32>,
    return
  }
}

</mosaic_0001>

<bundles_post_ra>
// kernel: tpu_custom_call.1
= control target key start
LH: loop header
LB: loop body
LE: loop exit
PB: predicated region body
PF: predicated region fallthrough
CT: control target
= control target key end

     0   :  { %8 = vsyncpa [#allocation3], 0  ;;  %s607_s0 = inlined_call_operand.hbm [shape: f32[5,4,14], index: 0, kind: input, shape index: {}]   ;;  %s608_s1 = inlined_call_operand.hbm [shape: f32[5,14,16], index: 1, kind: input, shape index: {}]   ;;  %s609_s2 = inlined_call_operand.hbm [shape: f32[5,1,16], index: 2, kind: input, shape index: {}]   ;;  %s610_s3 = inlined_call_operand.hbm [shape: f32[5,4,16], index: 3, kind: output, shape index: {}]  }
   0x1   :  { %9 = vsyncpa [#allocation6], 0 }
   0x2   :  { %10 = vsyncpa [#allocation4], 0  ;;  %s537_s12 = smov [#allocation5]  }
   0x3   :  { %s28_s13 = sshll.u32 %s537_s12, 4  ;;  %s29_s13 = int_to_ptr.vmem [resolvable:$true] %s28_s13 }
   0x4   :  { %s459_s14 = scalar_lea.vmem %s29_s13, 1280  ;;  %p464_p1 = scmp.lt.s32.totalorder %s29_s13, %s29_s13 }
   0x5   :  { %p460_p0 = scmp.ne.s32.totalorder %s29_s13, %s459_s14  ;;  %p465_p2 = scmp.lt.s32.totalorder %s459_s14, %s459_s14 }
   0x7   :  { %p466_p3 = por %p465_p2, %p464_p1 }
   0x9   :  { %p467_p4 = pnand %p466_p3, %p460_p0 }
   0xb   :  { %470 = shalt.err (!%p467_p4)
}
   0xc   :  { %s538_s15 = smov 128   ;;  %s539_s16 = smov 8  }
   0xd   :  { %34 = dma.hbm_to_vmem [thread:$0]  %s608_s1, 1280, %s29_s13, [#allocation6], %s538_s15, %s538_s15, %s539_s16  }
   0xe   :  { %s540_s19 = smov [#allocation2]  }
   0xf   :  { %s16_s20 = sshll.u32 %s540_s19, 4  ;;  %s17_s20 = int_to_ptr.vmem [resolvable:$true] %s16_s20 }
  0x10   :  { %s479_s21 = scalar_lea.vmem %s17_s20, 320  ;;  %p484_p6 = scmp.lt.s32.totalorder %s17_s20, %s17_s20 }
  0x11   :  { %p480_p5 = scmp.ne.s32.totalorder %s17_s20, %s479_s21  ;;  %p485_p7 = scmp.lt.s32.totalorder %s479_s21, %s479_s21 }
  0x13   :  { %p486_p8 = por %p485_p7, %p484_p6 }
  0x15   :  { %p487_p9 = pnand %p486_p8, %p480_p5 }
  0x17   :  { %490 = shalt.err (!%p487_p9)
}
  0x18   :  { %s541_s22 = smov 64   ;;  %s542_s23 = smov 4  }
  0x19   :  { %22 = dma.hbm_to_vmem [thread:$0]  %s607_s0, 320, %s17_s20, [#allocation3], %s541_s22, %s541_s22, %s542_s23  }
  0x1a   :  { %s543_s1 = smov [#allocation7]  }
  0x1b   :  { %s40_s26 = sshll.u32 %s543_s1, 4  ;;  %s41_s26 = int_to_ptr.vmem [resolvable:$true] %s40_s26 }
  0x1c   :  { %s499_s27 = scalar_lea.vmem %s41_s26, 80  ;;  %s503_s28 = scalar_lea.vmem %s41_s26, 96 }
  0x1d   :  { %p500_p10 = scmp.ne.s32.totalorder %s41_s26, %s499_s27  ;;  %p504_p11 = scmp.lt.s32.totalorder %s41_s26, %s41_s26 }
  0x1e   :  { %p505_p12 = scmp.lt.s32.totalorder %s503_s28, %s499_s27 }
  0x20   :  { %p506_p13 = por %p505_p12, %p504_p11 }
  0x22   :  { %p507_p0 = pnand %p506_p13, %p500_p10 }
  0x24   :  { %510 = shalt.err (!%p507_p0)
}
  0x25   :  { %s544_s29 = smov 16   ;;  %s545_s30 = smov 1  }
  0x26   :  { %46 = dma.hbm_to_vmem [thread:$0]  %s609_s2, 80, %s41_s26, [#allocation6], %s544_s29, %s544_s29, %s545_s30  }
  0x27   :  { %531 = dma.done.wait [#allocation3], 320  }
  0x28   :  { %532 = vsyncadd [#allocation3], 4294966976 }
  0x29   :  { %533 = dma.done.wait [#allocation6], 1360  }
  0x2a   :  { %534 = vsyncadd [#allocation6], 4294965936  ;;  %v546_v0 = vmov 0.0   ;;  %vm547_vm0 = vmmov 0   ;;  %v59_v1 = vld [vmem:[#allocation5] sm:$0xff]  ;;  %vm73_vm1 = vcmask 1046528  }
  0x2b   :  { %409 = vmatprep.subr.bf16.mxu0 %v546_v0  ;;  %411 = vmatprep.mubr.msk.bf16.mxu0 %vm547_vm0, %v546_v0  ;;  %v60_v2 = vld [vmem:[#allocation5 + $0x8] sm:$0x3f]  ;;  %v123_v5 = vld [vmem:[#allocation5 + $0x10] sm:$0xff]  ;;  %v124_v6 = vld [vmem:[#allocation5 + $0x18] sm:$0x3f]  ;;  %vm69_vm2 = vcmask 113664  }
  0x2c   :  { %415 = vmatprep.subr.bf16.mxu1 %v546_v0  ;;  %417 = vmatprep.mubr.msk.bf16.mxu1 %vm547_vm0, %v546_v0  ;;  %v57_v3 = vld [vmem:[#allocation2] sm:$0xf]  ;;  %v61_v4 = vpack.c.bf16 %v60_v2, %v59_v1  ;;  %v186_v7 = vld [vmem:[#allocation5 + $0x20] sm:$0xff]  ;;  %v125_v8 = vpack.c.bf16 %v124_v6, %v123_v5  ;;  %v120_v10 = vld [vmem:[#allocation2 + $0x4] sm:$0xf]  ;;  %vm117_vm3 = vcmask 125952  }
  0x2d   :  { %v187_v9 = vld [vmem:[#allocation5 + $0x28] sm:$0x3f]  ;;  %v58_v12 = vpack.c.bf16 %v57_v3, %v57_v3  ;;  %v249_v14 = vld [vmem:[#allocation5 + $0x30] sm:$0xff]  ;;  %v250_v15 = vld [vmem:[#allocation5 + $0x38] sm:$0x3f]  ;;  %v121_v17 = vpack.c.bf16 %v120_v10, %v120_v10  ;;  %s548_s0 = smov [#allocation8]  }
  0x2e   :  { %v75_v11 = vsel %vm73_vm1, %v61_v4, 0  ;;  %v188_v13 = vpack.c.bf16 %v187_v9, %v186_v7  ;;  %v138_v16 = vsel %vm73_vm1, %v125_v8, 0  ;;  %v251_v18 = vpack.c.bf16 %v250_v15, %v249_v14  ;;  %v312_v21 = vld [vmem:[#allocation5 + $0x40] sm:$0xff]  ;;  %v313_v22 = vld [vmem:[#allocation5 + $0x48] sm:$0x3f]  ;;  %s376_s2 = sshll.u32 %s548_s0, 4  ;;  %s377_s2 = int_to_ptr.vmem [resolvable:$true] %s376_s2 }
  0x2f   :  { %410 = vmatpush3.bf16.msra.mxu0 %v75_v11  ;;  %416 = vmatpush3.bf16.msra.mxu1 %v138_v16  ;;  %v183_v23 = vld [vmem:[#allocation2 + $0x8] sm:$0xf]  ;;  %v314_v24 = vpack.c.bf16 %v313_v22, %v312_v21  ;;  %v246_v25 = vld [vmem:[#allocation2 + $0xc] sm:$0xf]  ;;  %v309_v29 = vld [vmem:[#allocation2 + $0x10] sm:$0xf]  ;;  %p516_p2 = scmp.lt.s32.totalorder %s377_s2, %s377_s2 }
  0x30   :  { %421 = vmatprep.subr.bf16.mxu0 %v546_v0  ;;  %v201_v19 = vsel %vm73_vm1, %v188_v13, 0  ;;  %427 = vmatprep.subr.bf16.mxu1 %v546_v0  ;;  %v264_v20 = vsel %vm73_vm1, %v251_v18, 0  ;;  %v184_v26 = vpack.c.bf16 %v183_v23, %v183_v23  ;;  %v247_v27 = vpack.c.bf16 %v246_v25, %v246_v25  ;;  %v389_v31 = vld [vmem:[#allocation7] ss:$0 sm:$0xff]  ;;  %v391_v32 = vld [vmem:[#allocation7 + $0x1] ss:$0 sm:$0xff] }
  0x31   :  { %v327_v28 = vsel %vm73_vm1, %v314_v24, 0  ;;  %v310_v30 = vpack.c.bf16 %v309_v29, %v309_v29  ;;  %v393_v42 = vld [vmem:[#allocation7 + $0x2] ss:$0 sm:$0xff]  ;;  %v395_v44 = vld [vmem:[#allocation7 + $0x3] ss:$0 sm:$0xff]  ;;  %s511_s6 = scalar_lea.vmem %s377_s2, 320 }
  0x32   :  { %412 = vmatmul.mubr.msk.bf16.vlgmr.msra.gmra.mxu0 %vm69_vm2, %v58_v12  ;;  %418 = vmatmul.mubr.msk.bf16.vlgmr.msra.gmra.mxu1 %vm69_vm2, %v121_v17  ;;  %v397_v54 = vld [vmem:[#allocation7 + $0x4] ss:$0 sm:$0xff]  ;;  %p512_p1 = scmp.ne.s32.totalorder %s377_s2, %s511_s6  ;;  %p517_p3 = scmp.lt.s32.totalorder %s511_s6, %s511_s6 }
  0x33   :  { %422 = vmatpush3.bf16.msra.mxu0 %v201_v19  ;;  %423 = vmatprep.mubr.msk.bf16.mxu0 %vm547_vm0, %v546_v0 }
  0x34   :  { %428 = vmatpush3.bf16.msra.mxu1 %v264_v20  ;;  %433 = vmatprep.subr.bf16.mxu0 %v546_v0  ;;  %p518_p4 = por %p517_p3, %p516_p2 }
  0x35   :  { %429 = vmatprep.mubr.msk.bf16.mxu1 %vm547_vm0, %v546_v0 }
  0x36   :  { %p519_p5 = pnand %p518_p4, %p512_p1 }
  0x3a   :  { %424 = vmatmul.mubr.msk.bf16.vlgmr.msra.gmra.mxu0 %vm69_vm2, %v184_v26  ;;  %430 = vmatmul.mubr.msk.bf16.vlgmr.msra.gmra.mxu1 %vm69_vm2, %v247_v27 }
  0x3b   :  { %434 = vmatpush3.bf16.msra.mxu0 %v327_v28  ;;  %435 = vmatprep.mubr.msk.bf16.mxu0 %vm547_vm0, %v546_v0 }
  0x42   :  { %436 = vmatmul.mubr.msk.bf16.vlgmr.msra.gmra.mxu0 %vm69_vm2, %v310_v30 }
  0xf2   :  { %v111_v33 = vpop.f32.mrf.mxu0  ;;  %v174_v35 = vpop.f32.mrf.mxu1 }
  0xf3   :  { %v112_v34 = vadd.f32 %v389_v31, %v111_v33  ;;  %v175_v37 = vadd.f32 %v391_v32, %v174_v35 }
  0xf4   :  { %v413_v36 = vpop.f32.mrf.mxu0  ;;  %v419_v38 = vpop.f32.mrf.mxu1 }
  0xf5   :  { %118 = vst.msk [vmem:[#allocation8] sm:$0xf] %vm117_vm3, %v112_v34  ;;  %181 = vst.msk [vmem:[#allocation8 + $0x4] sm:$0xf] %vm117_vm3, %v175_v37 }
  0xf6   :  { %v114_v39 = vpop.f32.mrf.mxu0  ;;  %v177_v40 = vpop.f32.mrf.mxu1 }
  0xf8   :  { %v414_v41 = vpop.f32.mrf.mxu0  ;;  %v420_v43 = vpop.f32.mrf.mxu1 }
  0xfa   :  { %v237_v45 = vpop.f32.mrf.mxu0  ;;  %v300_v47 = vpop.f32.mrf.mxu1 }
  0xfb   :  { %v238_v46 = vadd.f32 %v393_v42, %v237_v45  ;;  %v301_v49 = vadd.f32 %v395_v44, %v300_v47 }
  0xfc   :  { %v425_v48 = vpop.f32.mrf.mxu0  ;;  %v431_v50 = vpop.f32.mrf.mxu1 }
  0xfd   :  { %244 = vst.msk [vmem:[#allocation8 + $0x8] sm:$0xf] %vm117_vm3, %v238_v46  ;;  %307 = vst.msk [vmem:[#allocation8 + $0xc] sm:$0xf] %vm117_vm3, %v301_v49 }
  0xfe   :  { %v240_v51 = vpop.f32.mrf.mxu0  ;;  %v303_v52 = vpop.f32.mrf.mxu1 }
 0x100   :  { %v426_v53 = vpop.f32.mrf.mxu0  ;;  %v432_v55 = vpop.f32.mrf.mxu1 }
 0x102   :  { %v363_v56 = vpop.f32.mrf.mxu0 }
 0x103   :  { %v364_v57 = vadd.f32 %v397_v54, %v363_v56 }
 0x104   :  { %v437_v58 = vpop.f32.mrf.mxu0 }
 0x105   :  { %370 = vst.msk [vmem:[#allocation8 + $0x10] sm:$0xf] %vm117_vm3, %v364_v57 }
 0x106   :  { %v366_v59 = vpop.f32.mrf.mxu0 }
 0x107   :  { %522 = shalt.err (!%p519_p5)
}
 0x108   :  { %382 = dma.vmem_to_hbm [thread:$0]  %s377_s2, 320, %s610_s3, [#allocation4], %s541_s22, %s541_s22, %s542_s23   ;;  %v438_v60 = vpop.f32.mrf.mxu0 }
 0x109   :  { %535 = dma.done.wait [#allocation4], 320  }
 0x10a   :  { %536 = vsyncadd [#allocation4], 4294966976 }
 0x10b   :  { %386 = vsyncpa [#allocation3], 1 }
 0x10c   :  { %387 = vsyncpa [#allocation6], 1 }
 0x10d   :  { %388 = vsyncpa [#allocation4], 1 }

</bundles_post_ra>
